<compile_context>
chip_gen: v6e
topology: v6e:2x2x1
jax: 0.10.0
libtpu: 0.0.40
codegen_flags: <defaults>
</compile_context>

<pallas_src>
import functools

import jax
import jax.numpy as jnp
from jax.experimental import pallas as pl
from jax.experimental.pallas import tpu as pltpu


# > 32 MiB scoped default on v5e/v6e, below the v7x 64 MiB physical cap.
VMEM_LIMIT_BYTES = 48 * 1024 * 1024


def _round_up(x, m):
    return (x + m - 1) // m * m


# ----------------------------------------------------------------------------
# Kernel 1: fused masked-mean pooling + projection (+ optional L2 normalize)
#   pooled[b] = sum_j x[b, j] * mask[b, j] / max(sum_j mask[b, j], 1)
#   reps[b]   = pooled[b] @ W + b        (bf16 operands, f32 accumulation)
# ----------------------------------------------------------------------------
def _pool_project_kernel(x_ref, m_ref, w_ref, b_ref, o_ref,
                         acc_ref, cnt_ref, *, normalize):
    sj = pl.program_id(1)

    @pl.when(sj == 0)
    def _():
        acc_ref[...] = jnp.zeros_like(acc_ref)
        cnt_ref[...] = jnp.zeros_like(cnt_ref)

    x = x_ref[...].astype(jnp.float32)            # (tb, ts, Din) lane=Din
    m = m_ref[...]                                # (tb, ts) f32 (pre-cast)
    # VPU mul + sublane/XLU reduction over the S-tile axis.
    acc_ref[...] += jnp.sum(x * m[:, :, None], axis=1)       # (tb, Din)
    cnt_ref[...] += jnp.sum(m, axis=1, keepdims=True)         # (tb, 1)

    @pl.when(sj == pl.num_programs(1) - 1)
    def _():
        # guard all-zero masks (padded batch rows) -> no NaN reps / NaN loss
        denom = jnp.maximum(cnt_ref[...], 1.0)
        pooled = acc_ref[...] / denom                          # (tb, Din) f32
        reps = jnp.dot(pooled.astype(jnp.bfloat16), w_ref[...],
                       preferred_element_type=jnp.float32) + b_ref[...]
        if normalize:
            reps = reps * jax.lax.rsqrt(
                jnp.sum(reps * reps, axis=-1, keepdims=True) + 1e-12)
        o_ref[...] = reps


def pool_project(x, mask, w_bf16, b, *, normalize, tb_pref=128, ts_pref=256):
    """Fused sentence_embedding (masked mean) + dense projection.

    x: (B, S, Din) token embeddings; mask: (B, S); w_bf16: (Din, H) bf16;
    b: (1, H) f32.  Returns (B, H) f32 sentence reps.
    """
    B, S, Din = x.shape
    H = w_bf16.shape[1]

    Din_pad = _round_up(Din, 128)                 # lane axis / MXU contraction
    tb = tb_pref if B >= tb_pref else _round_up(B, 8)
    B_pad = _round_up(B, tb)
    if S > ts_pref:                               # gridding S => 128-multiple
        ts = ts_pref
        S_pad = _round_up(S, ts)
    else:                                         # single full-S tile
        ts = S
        S_pad = S

    x_p = jnp.pad(x, ((0, B_pad - B), (0, S_pad - S), (0, Din_pad - Din)))
    m_p = jnp.pad(mask.astype(jnp.float32), ((0, B_pad - B), (0, S_pad - S)))
    w_p = jnp.pad(w_bf16, ((0, Din_pad - Din), (0, 0)))

    out = pl.pallas_call(
        functools.partial(_pool_project_kernel, normalize=normalize),
        out_shape=jax.ShapeDtypeStruct((B_pad, H), jnp.float32),
        grid=(B_pad // tb, S_pad // ts),
        in_specs=[
            pl.BlockSpec((tb, ts, Din_pad), lambda bi, sj: (bi, sj, 0)),
            pl.BlockSpec((tb, ts), lambda bi, sj: (bi, sj)),
            pl.BlockSpec((Din_pad, H), lambda bi, sj: (0, 0)),
            pl.BlockSpec((1, H), lambda bi, sj: (0, 0)),
        ],
        out_specs=pl.BlockSpec((tb, H), lambda bi, sj: (bi, 0)),
        scratch_shapes=[
            pltpu.VMEM((tb, Din_pad), jnp.float32),   # masked-sum accumulator
            pltpu.VMEM((tb, 1), jnp.float32),         # token-count accumulator
        ],
        compiler_params=pltpu.CompilerParams(
            dimension_semantics=("parallel", "arbitrary"),
            vmem_limit_bytes=VMEM_LIMIT_BYTES),
    )(x_p.astype(jnp.bfloat16), m_p, w_p, b)
    return out[:B]


# ----------------------------------------------------------------------------
# Kernel 2: fused similarity + per-row cross entropy (online log-sum-exp)
#   scores[i, j] = (q_i . p_j) / temperature
#   ce_row[i]    = logsumexp_j(scores[i, :]) - scores[i, i * group_size]
# ----------------------------------------------------------------------------
def _scores_loss_kernel(q_ref, p_ref, s_ref, l_ref,
                        m_sc, l_sc, pick_sc, *, inv_temp, group_size, bp):
    qi = pl.program_id(0)
    pi = pl.program_id(1)

    @pl.when(pi == 0)
    def _():
        m_sc[...] = jnp.full_like(m_sc, -jnp.inf)
        l_sc[...] = jnp.zeros_like(l_sc)
        pick_sc[...] = jnp.zeros_like(pick_sc)

    q = q_ref[...].astype(jnp.bfloat16)            # (tq, H)
    p = p_ref[...].astype(jnp.bfloat16)            # (tp, H)
    # contract the shared H axis directly -- no materialized p.T transpose
    s = jax.lax.dot_general(
        q, p, (((1,), (1,)), ((), ())),
        preferred_element_type=jnp.float32) * inv_temp        # (tq, tp) f32
    s_ref[...] = s

    tq, tp = s.shape
    col = jax.lax.broadcasted_iota(jnp.int32, s.shape, 1) + pi * tp
    row = jax.lax.broadcasted_iota(jnp.int32, s.shape, 0) + qi * tq
    valid = col < bp                               # mask zero-padded passages
    s_m = jnp.where(valid, s, -1e30)

    # online log-sum-exp across the Bp ("arbitrary") grid axis
    m_new = jnp.maximum(m_sc[...], jnp.max(s_m, axis=-1, keepdims=True))
    alpha = jnp.exp(m_sc[...] - m_new)
    l_sc[...] = alpha * l_sc[...] + jnp.sum(jnp.exp(s_m - m_new),
                                            axis=-1, keepdims=True)
    m_sc[...] = m_new

    # target logit: column i * group_size for global row i
    hit = jnp.logical_and(col == row * group_size, valid)
    pick_sc[...] += jnp.sum(jnp.where(hit, s, 0.0), axis=-1, keepdims=True)

    @pl.when(pi == pl.num_programs(1) - 1)
    def _():
        l_ref[...] = (m_sc[...] + jnp.log(l_sc[...])) - pick_sc[...]


def scores_and_ce_rows(q_reps, p_reps, *, temperature, group_size,
                       tq_pref=128, tp_pref=128):
    """Returns (scores (Bq, Bp), per-row CE losses (Bq,))."""
    Bq, H = q_reps.shape
    Bp = p_reps.shape[0]

    tq = tq_pref if Bq > tq_pref else Bq
    Bq_pad = _round_up(Bq, tq)
    tp = tp_pref if Bp > tp_pref else Bp           # 128-wide lane-dense tiles
    Bp_pad = _round_up(Bp, tp)

    q_p = jnp.pad(q_reps, ((0, Bq_pad - Bq), (0, 0)))
    p_p = jnp.pad(p_reps, ((0, Bp_pad - Bp), (0, 0)))

    scores, rowloss = pl.pallas_call(
        functools.partial(_scores_loss_kernel, inv_temp=1.0 / temperature,
                          group_size=group_size, bp=Bp),
        out_shape=(jax.ShapeDtypeStruct((Bq_pad, Bp_pad), jnp.float32),
                   jax.ShapeDtypeStruct((Bq_pad, 1), jnp.float32)),
        grid=(Bq_pad // tq, Bp_pad // tp),
        in_specs=[
            pl.BlockSpec((tq, H), lambda qi, pi: (qi, 0)),
            pl.BlockSpec((tp, H), lambda qi, pi: (pi, 0)),
        ],
        out_specs=(
            pl.BlockSpec((tq, tp), lambda qi, pi: (qi, pi)),
            pl.BlockSpec((tq, 1), lambda qi, pi: (qi, 0)),
        ),
        scratch_shapes=[
            pltpu.VMEM((tq, 1), jnp.float32),      # running max
            pltpu.VMEM((tq, 1), jnp.float32),      # running sum-exp
            pltpu.VMEM((tq, 1), jnp.float32),      # picked target logit
        ],
        compiler_params=pltpu.CompilerParams(
            dimension_semantics=("parallel", "arbitrary"),
            vmem_limit_bytes=VMEM_LIMIT_BYTES),
    )(q_p, p_p)
    return scores[:Bq, :Bp], rowloss[:Bq, 0]


# ----------------------------------------------------------------------------
# BiEncoderModel wrapper (JAX glue around the two fused Pallas kernels)
# ----------------------------------------------------------------------------
class BiEncoderModelPallas:
    def __init__(self, *, vocab_size=100, embed_dim=64, hidden_dim=128,
                 normlized=False, sentence_pooling_method="mean",
                 temperature=1.0, use_inbatch_neg=True, seed=0):
        self.normlized = normlized
        self.sentence_pooling_method = sentence_pooling_method
        # matches the torch module: inner product => temperature reset to 1.0
        self.temperature = temperature if normlized else 1.0
        self.use_inbatch_neg = use_inbatch_neg
        self.hidden_dim = hidden_dim

        key = jax.random.PRNGKey(seed)
        k_emb, k_w, k_b = jax.random.split(key, 3)
        # Deterministic synthetic stand-in for the HF transformer ("self.model").
        # TODO(synk): real AutoModel transformer backbone not ported; the
        #             per-token linear encoder is what makes pool-before-project
        #             fusion exact.
        self.embedding = jax.random.normal(k_emb, (vocab_size, embed_dim),
                                           jnp.float32) * 0.02
        self.w = jax.random.normal(k_w, (embed_dim, hidden_dim),
                                   jnp.float32) * 0.02
        self.b = jax.random.normal(k_b, (hidden_dim,), jnp.float32) * 0.02
        self.w_bf16 = self.w.astype(jnp.bfloat16)   # MXU operand (f32 accum)

    def _pooling_mask(self, attention_mask):
        s = attention_mask.shape[1]
        if self.sentence_pooling_method == "mean":
            return attention_mask
        if self.sentence_pooling_method == "cls":     # select token 0
            return jnp.zeros_like(attention_mask).at[:, 0].set(1)
        if self.sentence_pooling_method == "eos":     # select last token
            return jnp.zeros_like(attention_mask).at[:, s - 1].set(1)
        raise ValueError(self.sentence_pooling_method)

    def encode(self, features):
        if features is None:
            return None
        ids = features["input_ids"]
        mask = features["attention_mask"]
        # embedding gather stays in JAX (glue); everything downstream is Pallas
        x = jnp.take(self.embedding, ids, axis=0)          # (B, S, Din)
        return pool_project(x, self._pooling_mask(mask), self.w_bf16,
                            self.b.reshape(1, -1), normalize=self.normlized)

    def forward(self, query=None, passage=None, training=True):
        q_reps = self.encode(query)
        p_reps = self.encode(passage)
        # TODO(synk): negatives_cross_device dist.all_gather would need a
        #             make_async_remote_copy ring; single-chip only here.
        if training:
            group_size = p_reps.shape[0] // q_reps.shape[0]
            if self.use_inbatch_neg:
                scores, ce_rows = scores_and_ce_rows(
                    q_reps, p_reps, temperature=self.temperature,
                    group_size=group_size)
                loss = jnp.mean(ce_rows)
            else:
                # small per-query group scores: kept in plain JAX glue
                bq = q_reps.shape[0]
                p3 = p_reps.reshape(bq, group_size, -1)
                scores = jnp.einsum("bh,bgh->bg", q_reps, p3) / self.temperature
                loss = jnp.mean(jax.nn.logsumexp(scores, axis=-1)
                                - scores[:, 0])
        else:
            scores, _ = scores_and_ce_rows(q_reps, p_reps, temperature=1.0,
                                           group_size=1)
            loss = None
        return {"loss": loss, "scores": scores,
                "q_reps": q_reps, "p_reps": p_reps}


# ----------------------------------------------------------------------------
if __name__ == "__main__":
    key = jax.random.PRNGKey(0)
    k1, k2 = jax.random.split(key)

    BQ, GROUP, S, VOCAB = 2, 2, 8, 100
    BP = BQ * GROUP

    q_ids = jax.random.randint(k1, (BQ, S), 0, VOCAB, dtype=jnp.int32)
    p_ids = jax.random.randint(k2, (BP, S), 0, VOCAB, dtype=jnp.int32)
    # attention masks with a couple of padded positions
    q_mask = jnp.ones((BQ, S), jnp.int32).at[:, -2:].set(0)
    p_mask = jnp.ones((BP, S), jnp.int32).at[:, -1:].set(0)

    model = BiEncoderModelPallas(vocab_size=VOCAB, embed_dim=64,
                                 hidden_dim=128,
                                 sentence_pooling_method="mean",
                                 normlized=False, use_inbatch_neg=True)

    out = model.forward(
        query={"input_ids": q_ids, "attention_mask": q_mask},
        passage={"input_ids": p_ids, "attention_mask": p_mask},
        training=True,
    )
    jax.block_until_ready(out["loss"])
    jax.block_until_ready(out["scores"])

    # sanity check against a plain-JAX fp32 reference (project-then-pool, the
    # original op order; the fused kernel pools first, which is mathematically
    # identical for the per-token linear backbone)
    def ref_encode(ids, mask):
        x = jnp.take(model.embedding, ids, axis=0)
        h = x @ model.w + model.b
        m = mask.astype(jnp.float32)
        return (h * m[:, :, None]).sum(1) / m.sum(1, keepdims=True)

    q_ref = ref_encode(q_ids, q_mask)
    p_ref = ref_encode(p_ids, p_mask)
    s_ref = q_ref @ p_ref.T                        # temperature == 1.0 here
    tgt = jnp.arange(BQ) * GROUP
    loss_ref = jnp.mean(jax.nn.logsumexp(s_ref, axis=-1)
                        - s_ref[jnp.arange(BQ), tgt])

    assert out["q_reps"].shape == (BQ, 128)
    assert out["scores"].shape == (BQ, BP)
    # bf16 MXU operands with f32 accumulation => slightly looser tolerance
    assert jnp.allclose(out["q_reps"], q_ref, atol=2e-3, rtol=2e-2)
    assert jnp.allclose(out["scores"], s_ref, atol=2e-3, rtol=2e-2)
    assert jnp.allclose(out["loss"], loss_ref, atol=2e-3, rtol=2e-2)

    print("KERNEL_OK")
</pallas_src>

<mosaic_0001>
module attributes {stable_mosaic.version = 11 : i64} {
  func.func @_pool_project_kernel(%arg0: i32, %arg1: i32, %arg2: memref<8x8x128xbf16, #tpu.memory_space<vmem>>, %arg3: memref<8x8xf32, #tpu.memory_space<vmem>>, %arg4: memref<128x128xbf16, #tpu.memory_space<vmem>>, %arg5: memref<1x128xf32, #tpu.memory_space<vmem>>, %arg6: memref<8x128xf32, #tpu.memory_space<vmem>>, %arg7: memref<8x128xf32, #tpu.memory_space<vmem>>, %arg8: memref<8x1xf32, #tpu.memory_space<vmem>>) attributes {dimension_semantics = [#tpu.dimension_semantics<parallel>, #tpu.dimension_semantics<arbitrary>], iteration_bounds = array<i64: 1, 1>, scalar_prefetch = 0 : i64, scratch_operands = 2 : i64, tpu.core_type = #tpu.core_type<tc>, window_params = [{transform_indices = @transform_0, window_bounds = array<i64: 8, 8, 128>}, {transform_indices = @transform_1, window_bounds = array<i64: 8, 8>}, {pipeline_mode = #tpu.pipeline_mode<synchronous>, transform_indices = @transform_2, window_bounds = array<i64: 128, 128>}, {pipeline_mode = #tpu.pipeline_mode<synchronous>, transform_indices = @transform_3, window_bounds = array<i64: 1, 128>}, {transform_indices = @transform_4, window_bounds = array<i64: 8, 128>}]} {
    %c0_i32 = arith.constant 0 : i32
    %0 = arith.cmpi eq, %arg1, %c0_i32 : i32
    %1 = arith.extui %0 : i1 to i32
    %c0_i32_0 = arith.constant 0 : i32
    %2 = arith.cmpi ne, %1, %c0_i32_0 : i32
    scf.if %2 {
      %cst_16 = arith.constant 0.000000e+00 : f32
      %21 = vector.broadcast %cst_16 : f32 to vector<8x128xf32>
      %c0_17 = arith.constant 0 : index
      %c0_18 = arith.constant 0 : index
      %22 = vector.load %arg7[%c0_17, %c0_18] : memref<8x128xf32, #tpu.memory_space<vmem>>, vector<8x128xf32>
      tpu.vector_store %arg7[%c0_17, %c0_18], %21 {strides = array<i32>} : memref<8x128xf32, #tpu.memory_space<vmem>>, vector<8x128xf32>,
      %cst_19 = arith.constant 0.000000e+00 : f32
      %23 = vector.broadcast %cst_19 : f32 to vector<8x1xf32>
      %c0_20 = arith.constant 0 : index
      %c0_21 = arith.constant 0 : index
      %24 = vector.load %arg8[%c0_20, %c0_21] : memref<8x1xf32, #tpu.memory_space<vmem>>, vector<8x1xf32>
      tpu.vector_store %arg8[%c0_20, %c0_21], %23 {strides = array<i32>} : memref<8x1xf32, #tpu.memory_space<vmem>>, vector<8x1xf32>,
    } else {
    }
    %c0 = arith.constant 0 : index
    %c0_1 = arith.constant 0 : index
    %c0_2 = arith.constant 0 : index
    %3 = vector.load %arg2[%c0, %c0_1, %c0_2] : memref<8x8x128xbf16, #tpu.memory_space<vmem>>, vector<8x8x128xbf16>
    %4 = arith.extf %3 : vector<8x8x128xbf16> to vector<8x8x128xf32>
    %c0_3 = arith.constant 0 : index
    %c0_4 = arith.constant 0 : index
    %5 = vector.load %arg3[%c0_3, %c0_4] : memref<8x8xf32, #tpu.memory_space<vmem>>, vector<8x8xf32>
    %c0_5 = arith.constant 0 : index
    %c0_6 = arith.constant 0 : index
    %6 = vector.load %arg7[%c0_5, %c0_6] : memref<8x128xf32, #tpu.memory_space<vmem>>, vector<8x128xf32>
    %7 = vector.shape_cast %5 : vector<8x8xf32> to vector<8x8x1xf32>
    %8 = vector.broadcast %7 : vector<8x8x1xf32> to vector<8x8x128xf32>
    %9 = arith.mulf %4, %8 : vector<8x8x128xf32>
    %cst = arith.constant dense<0.000000e+00> : vector<8x128xf32>
    %10 = vector.multi_reduction <add>, %9, %cst [1] : vector<8x8x128xf32> to vector<8x128xf32>
    %11 = arith.addf %6, %10 : vector<8x128xf32>
    %c0_7 = arith.constant 0 : index
    %c0_8 = arith.constant 0 : index
    %12 = vector.load %arg7[%c0_7, %c0_8] : memref<8x128xf32, #tpu.memory_space<vmem>>, vector<8x128xf32>
    tpu.vector_store %arg7[%c0_7, %c0_8], %11 {strides = array<i32>} : memref<8x128xf32, #tpu.memory_space<vmem>>, vector<8x128xf32>,
    %c0_9 = arith.constant 0 : index
    %c0_10 = arith.constant 0 : index
    %13 = vector.load %arg8[%c0_9, %c0_10] : memref<8x1xf32, #tpu.memory_space<vmem>>, vector<8x1xf32>
    %cst_11 = arith.constant dense<0.000000e+00> : vector<8xf32>
    %14 = vector.multi_reduction <add>, %5, %cst_11 [1] : vector<8x8xf32> to vector<8xf32>
    %15 = vector.shape_cast %14 : vector<8xf32> to vector<8x1xf32>
    %16 = arith.addf %13, %15 : vector<8x1xf32>
    %c0_12 = arith.constant 0 : index
    %c0_13 = arith.constant 0 : index
    %17 = vector.load %arg8[%c0_12, %c0_13] : memref<8x1xf32, #tpu.memory_space<vmem>>, vector<8x1xf32>
    tpu.vector_store %arg8[%c0_12, %c0_13], %16 {strides = array<i32>} : memref<8x1xf32, #tpu.memory_space<vmem>>, vector<8x1xf32>,
    %c0_i32_14 = arith.constant 0 : i32
    %18 = arith.cmpi eq, %arg1, %c0_i32_14 : i32
    %19 = arith.extui %18 : i1 to i32
    %c0_i32_15 = arith.constant 0 : i32
    %20 = arith.cmpi ne, %19, %c0_i32_15 : i32
    scf.if %20 {
      %c0_16 = arith.constant 0 : index
      %c0_17 = arith.constant 0 : index
      %21 = vector.load %arg8[%c0_16, %c0_17] : memref<8x1xf32, #tpu.memory_space<vmem>>, vector<8x1xf32>
      %cst_18 = arith.constant 1.000000e+00 : f32
      %22 = vector.broadcast %cst_18 : f32 to vector<8x1xf32>
      %23 = arith.maximumf %21, %22 : vector<8x1xf32>
      %c0_19 = arith.constant 0 : index
      %c0_20 = arith.constant 0 : index
      %24 = vector.load %arg7[%c0_19, %c0_20] : memref<8x128xf32, #tpu.memory_space<vmem>>, vector<8x128xf32>
      %25 = vector.broadcast %23 : vector<8x1xf32> to vector<8x128xf32>
      %26 = arith.divf %24, %25 : vector<8x128xf32>
      %27 = arith.truncf %26 : vector<8x128xf32> to vector<8x128xbf16>
      %c0_21 = arith.constant 0 : index
      %c0_22 = arith.constant 0 : index
      %28 = vector.load %arg4[%c0_21, %c0_22] : memref<128x128xbf16, #tpu.memory_space<vmem>>, vector<128x128xbf16>
      %cst_23 = arith.constant dense<0.000000e+00> : vector<8x128xf32>
      %29 = tpu.matmul %27, %28, %cst_23 {dimension_numbers = #tpu.dot_dimension_numbers<[1], [0], [0], [1], [0, 0, 1, 1], [], []>} : vector<8x128xbf16>, vector<128x128xbf16>, vector<8x128xf32> -> vector<8x128xf32>
      %c0_24 = arith.constant 0 : index
      %c0_25 = arith.constant 0 : index
      %30 = vector.load %arg5[%c0_24, %c0_25] : memref<1x128xf32, #tpu.memory_space<vmem>>, vector<1x128xf32>
      %31 = vector.broadcast %30 : vector<1x128xf32> to vector<8x128xf32>
      %32 = arith.addf %29, %31 : vector<8x128xf32>
      %c0_26 = arith.constant 0 : index
      %c0_27 = arith.constant 0 : index
      %33 = vector.load %arg6[%c0_26, %c0_27] : memref<8x128xf32, #tpu.memory_space<vmem>>, vector<8x128xf32>
      tpu.vector_store %arg6[%c0_26, %c0_27], %32 {strides = array<i32>} : memref<8x128xf32, #tpu.memory_space<vmem>>, vector<8x128xf32>,
    } else {
    }
    return
  }
  func.func @transform_0(%arg0: i32, %arg1: i32) -> (i32, i32, i32) {
    %c0_i32 = arith.constant 0 : i32
    %c0_i32_0 = arith.constant 0 : i32
    return %arg0, %arg1, %c0_i32 : i32, i32, i32
  }
  func.func @transform_1(%arg0: i32, %arg1: i32) -> (i32, i32) {
    %c0_i32 = arith.constant 0 : i32
    return %arg0, %arg1 : i32, i32
  }
  func.func @transform_2(%arg0: i32, %arg1: i32) -> (i32, i32) {
    %c0_i32 = arith.constant 0 : i32
    %c0_i32_0 = arith.constant 0 : i32
    %c0_i32_1 = arith.constant 0 : i32
    return %c0_i32, %c0_i32_0 : i32, i32
  }
  func.func @transform_3(%arg0: i32, %arg1: i32) -> (i32, i32) {
    %c0_i32 = arith.constant 0 : i32
    %c0_i32_0 = arith.constant 0 : i32
    %c0_i32_1 = arith.constant 0 : i32
    return %c0_i32, %c0_i32_0 : i32, i32
  }
  func.func @transform_4(%arg0: i32, %arg1: i32) -> (i32, i32) {
    %c0_i32 = arith.constant 0 : i32
    %c0_i32_0 = arith.constant 0 : i32
    return %arg0, %c0_i32 : i32, i32
  }
}

</mosaic_0001>

<bundles_post_ra>
// kernel: tpu_custom_call.1
= control target key start
LH: loop header
LB: loop body
LE: loop exit
PB: predicated region body
PF: predicated region fallthrough
CT: control target
= control target key end

     0   :  { %9 = vsyncpa [#allocation5], 0  ;;  %s595_s0 = inlined_call_operand.hbm [shape: bf16[8,8,128], index: 0, kind: input, shape index: {}]   ;;  %s596_s1 = inlined_call_operand.hbm [shape: f32[8,8], index: 1, kind: input, shape index: {}]   ;;  %s597_s2 = inlined_call_operand.hbm [shape: bf16[128,128], index: 2, kind: input, shape index: {}]   ;;  %s598_s3 = inlined_call_operand.vmem [shape: f32[1,128], index: 3, kind: input, shape index: {}]   ;;  %s599_s4 = inlined_call_operand.hbm [shape: f32[8,128], index: 4, kind: output, shape index: {}]  }
   0x1   :  { %10 = vsyncpa [#allocation8], 0 }
   0x2   :  { %11 = vsyncpa [#allocation6], 0  ;;  %s534_s15 = smov [#allocation7]   ;;  %s535_s17 = smov [#allocation4]  }
   0x3   :  { %s30_s16 = sshll.u32 %s534_s15, 4  ;;  %s17_s18 = sshll.u32 %s535_s17, 4  ;;  %s31_s16 = int_to_ptr.vmem [resolvable:$true] %s30_s16  ;;  %s18_s18 = int_to_ptr.vmem [resolvable:$true] %s17_s18 }
   0x4   :  { %s456_s19 = scalar_lea.vmem %s31_s16, 128  ;;  %p461_p1 = scmp.lt.s32.totalorder %s31_s16, %s31_s16 }
   0x5   :  { %p457_p0 = scmp.ne.s32.totalorder %s31_s16, %s456_s19  ;;  %p462_p2 = scmp.lt.s32.totalorder %s456_s19, %s456_s19 }
   0x7   :  { %p463_p3 = por %p462_p2, %p461_p1 }
   0x9   :  { %p464_p4 = pnand %p463_p3, %p457_p0 }
   0xb   :  { %467 = shalt.err (!%p464_p4)
}
   0xc   :  { %33 = dma.hbm_to_vmem [thread:$0]  %s596_s1, 128, %s31_s16, [#allocation8]  }
   0xd   :  { %s476_s22 = scalar_lea.vmem %s18_s18, 512  ;;  %p481_p6 = scmp.lt.s32.totalorder %s18_s18, %s18_s18 }
   0xe   :  { %p477_p5 = scmp.ne.s32.totalorder %s18_s18, %s476_s22  ;;  %p482_p7 = scmp.lt.s32.totalorder %s476_s22, %s476_s22 }
  0x10   :  { %p483_p8 = por %p482_p7, %p481_p6 }
  0x12   :  { %p484_p9 = pnand %p483_p8, %p477_p5 }
  0x14   :  { %487 = shalt.err (!%p484_p9)
}
  0x15   :  { %s536_s23 = smov 64   ;;  %s537_s24 = smov 4  }
  0x16   :  { %23 = dma.hbm_to_vmem [thread:$0]  %s595_s0, 512, %s18_s18, [#allocation5], %s536_s23, %s536_s23, %s537_s24  }
  0x17   :  { %s538_s27 = smov [#allocation9]  }
  0x18   :  { %s39_s28 = sshll.u32 %s538_s27, 4  ;;  %s40_s28 = int_to_ptr.vmem [resolvable:$true] %s39_s28 }
  0x19   :  { %s496_s29 = scalar_lea.vmem %s40_s28, 1024  ;;  %p501_p11 = scmp.lt.s32.totalorder %s40_s28, %s40_s28 }
  0x1a   :  { %p497_p10 = scmp.ne.s32.totalorder %s40_s28, %s496_s29  ;;  %p502_p12 = scmp.lt.s32.totalorder %s496_s29, %s496_s29 }
  0x1c   :  { %p503_p13 = por %p502_p12, %p501_p11 }
  0x1e   :  { %p504_p0 = pnand %p503_p13, %p497_p10 }
  0x20   :  { %507 = shalt.err (!%p504_p0)
}
  0x21   :  { %45 = dma.hbm_to_vmem [thread:$0]  %s597_s2, 1024, %s40_s28, [#allocation8], %s536_s23, %s536_s23, %s537_s24  }
  0x22   :  { %528 = dma.done.wait [#allocation5], 512  }
  0x23   :  { %529 = vsyncadd [#allocation5], 4294966784 }
  0x24   :  { %530 = dma.done.wait [#allocation8], 1152  }
  0x25   :  { %531 = vsyncadd [#allocation8], 4294966144  ;;  %v83_v0 = vlaneseq  ;;  %vm63_vm0 = vcmask 7168   ;;  %v539_v1 = vmov 0.0   ;;  %vm221_vm1 = vcmask 64512   ;;  %v81_v5 = vld [vmem:[#allocation7] sm:$0xff] }
  0x26   :  { %64 = vst.msk [vmem:[#allocation3] sm:$0xff] %vm63_vm0, %v539_v1  ;;  %407 = vmatprep.subr.bf16.mxu0 %v539_v1  ;;  %v222_v6 = vsel %vm221_vm1, %v81_v5, 0.0  ;;  %v540_v15 = vmov 0   ;;  %v438_v22 = vld [vmem:[#allocation9 + $0x38] sm:$0xff]   ;;  %v439_v23 = vld [vmem:[#allocation9 + $0x30] sm:$0xff]   ;;  %v440_v27 = vld [vmem:[#allocation9 + $0x28] sm:$0xff]  }
  0x27   :  { %v84_v2 = vshrl.u32 %v83_v0, 7  ;;  %223 = vadd.xlane.f32.xlu0 %v222_v6  ;;  %436 = vset.pattern.permute.xlu1 %v540_v15  ;;  %v441_v30 = vld [vmem:[#allocation9 + $0x20] sm:$0xff]   ;;  %v442_v31 = vld [vmem:[#allocation9 + $0x18] sm:$0xff]   ;;  %v443_v32 = vld [vmem:[#allocation9 + $0x10] sm:$0xff]   ;;  %vm541_vm2 = vmmov 0   ;;  %vm203_vm3 = vcmask 1041409  }
  0x28   :  { %437 = vset.pattern.permute.xlu0 %v540_v15  ;;  %408 = vmatpush3.bf16.msra.mxu0 %v438_v22  ;;  %v444_v33 = vld [vmem:[#allocation9 + $0x8] sm:$0xff]   ;;  %v445_v34 = vld [vmem:[#allocation9] sm:$0xff]   ;;  %v380_v37 = vld [vmem:[#allocation4] sm:$0xff]   ;;  %vm205_vm4 = vcmask 1042434   ;;  %vm207_vm5 = vcmask 1043459   ;;  %vm209_vm6 = vcmask 1044484  }
  0x29   :  { %v92_v3 = vsub.s32 1, %v84_v2  ;;  %v99_v4 = vsub.s32 2, %v84_v2  ;;  %v106_v9 = vsub.s32 3, %v84_v2  ;;  %v113_v11 = vsub.s32 4, %v84_v2  ;;  %409 = vmatprep.subr.bf16.mxu0 %v539_v1  ;;  %423 = vmatprep.mubr.msk.bf16.mxu0 %vm541_vm2, %v539_v1  ;;  %v395_v39 = vld [vmem:[#allocation4 + $0x8] sm:$0xff]   ;;  %v396_v47 = vld [vmem:[#allocation4 + $0x10] sm:$0xff]  }
  0x2a   :  { %v120_v13 = vsub.s32 5, %v84_v2  ;;  %v85_v16 = vsub.s32 0, %v84_v2  ;;  %v134_v18 = vsub.s32 7, %v84_v2  ;;  %v127_v19 = vsub.s32 6, %v84_v2  ;;  %v397_v60 = vld [vmem:[#allocation4 + $0x18] sm:$0xff]   ;;  %s542_s5 = smov [#allocation10]  }
  0x2b   :  { %v93_v7 = vrot.slane %v81_v5, %v92_v3  ;;  %v100_v8 = vrot.slane %v81_v5, %v99_v4  ;;  %v107_v10 = vrot.slane %v81_v5, %v106_v9  ;;  %v114_v12 = vrot.slane %v81_v5, %v113_v11  ;;  %s360_s6 = sshll.u32 %s542_s5, 4  ;;  %s361_s6 = int_to_ptr.vmem [resolvable:$true] %s360_s6 }
  0x2c   :  { %v121_v14 = vrot.slane %v81_v5, %v120_v13  ;;  %v86_v17 = vrot.slane %v81_v5, %v85_v16  ;;  %v135_v20 = vrot.slane %v81_v5, %v134_v18  ;;  %v128_v21 = vrot.slane %v81_v5, %v127_v19  ;;  %410 = vmatpush3.bf16.msra.mxu0 %v439_v23  ;;  %s508_s7 = scalar_lea.vmem %s361_s6, 128  ;;  %p513_p2 = scmp.lt.s32.totalorder %s361_s6, %s361_s6 }
  0x2d   :  { %95 = vbcast.lane.b32.xlu1 %v93_v7, 256  ;;  %411 = vmatprep.subr.bf16.mxu0 %v539_v1  ;;  %v220_v24 = vld [vmem:[#allocation3] sm:$0xff]  ;;  %v382_v38 = vunpack.c.h.bf16 %v380_v37  ;;  %v381_v40 = vunpack.c.l.bf16 %v380_v37  ;;  %v385_v43 = vunpack.c.l.bf16 %v395_v39  ;;  %v386_v46 = vunpack.c.h.bf16 %v395_v39  ;;  %p509_p1 = scmp.ne.s32.totalorder %s361_s6, %s508_s7  ;;  %p514_p3 = scmp.lt.s32.totalorder %s508_s7, %s508_s7 }
  0x2e   :  { %v389_v52 = vunpack.c.l.bf16 %v396_v47  ;;  %v390_v57 = vunpack.c.h.bf16 %v396_v47  ;;  %v394_v2 = vunpack.c.h.bf16 %v397_v60  ;;  %v393_v22 = vunpack.c.l.bf16 %v397_v60 }
  0x2f   :  { %vm211_vm7 = vcmask 1045509   ;;  %vm213_vm8 = vcmask 1046534   ;;  %vm215_vm9 = vcmask 1047559   ;;  %p515_p4 = por %p514_p3, %p513_p2 }
  0x30   :  { %412 = vmatpush3.bf16.msra.mxu0 %v440_v27 }
  0x31   :  { %102 = vbcast.lane.b32.xlu1 %v100_v8, 256  ;;  %413 = vmatprep.subr.bf16.mxu0 %v539_v1  ;;  %p516_p5 = pnand %p515_p4, %p509_p1 }
  0x34   :  { %414 = vmatpush3.bf16.msra.mxu0 %v441_v30 }
  0x35   :  { %109 = vbcast.lane.b32.xlu1 %v107_v10, 256  ;;  %415 = vmatprep.subr.bf16.mxu0 %v539_v1 }
  0x38   :  { %416 = vmatpush3.bf16.msra.mxu0 %v442_v31 }
  0x39   :  { %116 = vbcast.lane.b32.xlu1 %v114_v12, 256  ;;  %417 = vmatprep.subr.bf16.mxu0 %v539_v1 }
  0x3c   :  { %418 = vmatpush3.bf16.msra.mxu0 %v443_v32 }
  0x3d   :  { %123 = vbcast.lane.b32.xlu1 %v121_v14, 256  ;;  %88 = vbcast.lane.b32.xlu0 %v86_v17, 256 }
  0x3e   :  { %419 = vmatprep.subr.bf16.mxu0 %v539_v1 }
  0x40   :  { %420 = vmatpush3.bf16.msra.mxu0 %v444_v33 }
  0x41   :  { %137 = vbcast.lane.b32.xlu0 %v135_v20, 256  ;;  %421 = vmatprep.subr.bf16.mxu0 %v539_v1 }
  0x44   :  { %422 = vmatpush3.bf16.msra.mxu0 %v445_v34 }
  0x9f   :  { %v96_v35 = vpop.permute.xlu1 %95 }
  0xa0   :  { %v140_v44 = vmul.f32 %v382_v38, %v96_v35 }
  0xa2   :  { %v153_v50 = vrot.slane %v140_v44, 4 }
  0xa3   :  { %v103_v36 = vpop.permute.xlu1 %102 }
  0xa4   :  { %v141_v48 = vmul.f32 %v385_v43, %v103_v36  ;;  %v154_v55 = vadd.f32 %v153_v50, %v140_v44 }
  0xa6   :  { %v159_v54 = vrot.slane %v141_v48, 4  ;;  %v155_v63 = vrot.slane %v154_v55, 2 }
  0xa7   :  { %v110_v41 = vpop.permute.xlu1 %109 }
  0xa8   :  { %v142_v53 = vmul.f32 %v386_v46, %v110_v41  ;;  %v160_v62 = vadd.f32 %v159_v54, %v141_v48  ;;  %v156_v7 = vadd.f32 %v155_v63, %v154_v55 }
  0xaa   :  { %v165_v61 = vrot.slane %v142_v53, 4  ;;  %v161_v6 = vrot.slane %v160_v62, 2  ;;  %v157_v14 = vrot.slane %v156_v7, 1 }
  0xab   :  { %v117_v49 = vpop.permute.xlu1 %116 }
  0xac   :  { %v143_v58 = vmul.f32 %v389_v52, %v117_v49  ;;  %v166_v5 = vadd.f32 %v165_v61, %v142_v53  ;;  %v162_v13 = vadd.f32 %v161_v6, %v160_v62  ;;  %v158_v23 = vadd.f32 %v157_v14, %v156_v7 }
  0xae   :  { %v171_v3 = vrot.slane %v143_v58, 4  ;;  %v167_v12 = vrot.slane %v166_v5, 2 }
  0xaf   :  { %v124_v59 = vpop.permute.xlu1 %123 }
  0xb0   :  { %v224_v25 = vpop.xlane.xlu0 %223  ;;  %v144_v1 = vmul.f32 %v390_v57, %v124_v59  ;;  %v172_v11 = vadd.f32 %v171_v3, %v143_v58  ;;  %v168_v19 = vadd.f32 %v167_v12, %v166_v5  ;;  %v370_v58 = vld [vmem:[%s598_s3] ss:$0 sm:$0xff] }
  0xb1   :  { %v225_v26 = vadd.f32 %v224_v25, %v220_v24 }
  0xb2   :  { %v177_v9 = vrot.slane %v144_v1, 4  ;;  %v173_v18 = vrot.slane %v172_v11, 2 }
  0xb3   :  { %227 = vst.msk [vmem:[#allocation3] sm:$0xff] %vm63_vm0, %v225_v26 }
  0xb4   :  { %v89_v42 = vpop.permute.xlu0 %88  ;;  %v178_v16 = vadd.f32 %v177_v9, %v144_v1  ;;  %v174_v27 = vadd.f32 %v173_v18, %v172_v11 }
  0xb5   :  { %v139_v45 = vmul.f32 %v381_v40, %v89_v42 }
  0xb6   :  { %v179_v25 = vrot.slane %v178_v16, 2  ;;  %v175_v35 = vrot.slane %v174_v27, 1 }
  0xb7   :  { %v147_v51 = vrot.slane %v139_v45, 4 }
  0xb8   :  { %v138_v4 = vpop.permute.xlu0 %137  ;;  %v180_v33 = vadd.f32 %v179_v25, %v178_v16  ;;  %v176_v42 = vadd.f32 %v175_v35, %v174_v27 }
  0xb9   :  { %v148_v56 = vadd.f32 %v147_v51, %v139_v45  ;;  %v146_v10 = vmul.f32 %v394_v2, %v138_v4 }
  0xba   :  { %v231_v28 = vld [vmem:[#allocation3] sm:$0xff]  ;;  %v181_v40 = vrot.slane %v180_v33, 1 }
  0xbb   :  { %v232_v29 = vmax.f32 %v231_v28, 1.0  ;;  %v149_v0 = vrot.slane %v148_v56, 2  ;;  %v189_v17 = vrot.slane %v146_v10, 4  ;;  %v169_v28 = vrot.slane %v168_v19, 1 }
  0xbc   :  { %v182_v46 = vadd.f32 %v181_v40, %v180_v33 }
  0xbd   :  { %236 = vperm.xlu1 %436, %v232_v29   ;;  %v150_v8 = vadd.f32 %v149_v0, %v148_v56  ;;  %v190_v26 = vadd.f32 %v189_v17, %v146_v10  ;;  %v170_v37 = vadd.f32 %v169_v28, %v168_v19 }
  0xbf   :  { %v151_v15 = vrot.slane %v150_v8, 1  ;;  %v191_v34 = vrot.slane %v190_v26, 2 }
  0xc1   :  { %130 = vbcast.lane.b32.xlu1 %v128_v21, 256  ;;  %v163_v21 = vrot.slane %v162_v13, 1  ;;  %v152_v24 = vadd.f32 %v151_v15, %v150_v8  ;;  %v192_v41 = vadd.f32 %v191_v34, %v190_v26 }
  0xc3   :  { %v164_v30 = vadd.f32 %v163_v21, %v162_v13  ;;  %v204_v32 = vsel %vm203_vm3, %v158_v23, %v152_v24  ;;  %v193_v47 = vrot.slane %v192_v41, 1 }
  0xc5   :  { %v206_v38 = vsel %vm205_vm4, %v164_v30, %v204_v32  ;;  %v194_v51 = vadd.f32 %v193_v47, %v192_v41 }
  0xc6   :  { %v208_v44 = vsel %vm207_vm5, %v170_v37, %v206_v38 }
  0xc7   :  { %v210_v49 = vsel %vm209_vm6, %v176_v42, %v208_v44 }
  0xc8   :  { %v212_v52 = vsel %vm211_vm7, %v182_v46, %v210_v49 }
 0x138   :  { %v237_v20 = vpop.permute.xlu1 %236 }
 0x139   :  { %446 = vrcp.f32 %v237_v20 }
 0x13c   :  { %v131_v29 = vpop.permute.xlu1 %130 }
 0x13d   :  { %v145_v31 = vmul.f32 %v393_v22, %v131_v29 }
 0x13f   :  { %v183_v36 = vrot.slane %v145_v31, 4 }
 0x141   :  { %v184_v39 = vadd.f32 %v183_v36, %v145_v31 }
 0x143   :  { %v185_v43 = vrot.slane %v184_v39, 2 }
 0x145   :  { %v186_v45 = vadd.f32 %v185_v43, %v184_v39 }
 0x146   :  { %v447_v54 = vpop.eup %446 }
 0x147   :  { %v187_v48 = vrot.slane %v186_v45, 1 }
 0x149   :  { %v188_v50 = vadd.f32 %v187_v48, %v186_v45 }
 0x14b   :  { %v214_v53 = vsel %vm213_vm8, %v188_v50, %v212_v52 }
 0x14c   :  { %v216_v55 = vsel %vm215_vm9, %v194_v51, %v214_v53 }
 0x14d   :  { %v240_v56 = vmul.f32 %v447_v54, %v216_v55 }
 0x14f   :  { %v241_v57 = vpack.c.bf16 %v240_v56, %v240_v56 }
 0x151   :  { %424 = vmatmul.mubr.bf16.vlgmr.msra.gmra.mxu0 %v241_v57 }
 0x211   :  { %v347_v59 = vpop.f32.mrf.mxu0 }
 0x212   :  { %v348_v60 = vadd.f32 %v370_v58, %v347_v59 }
 0x213   :  { %v425_v61 = vpop.f32.mrf.mxu0 }
 0x214   :  { %353 = vst [vmem:[#allocation10] sm:$0xff] %v348_v60 }
 0x215   :  { %v350_v62 = vpop.f32.mrf.mxu0 }
 0x216   :  { %519 = shalt.err (!%p516_p5)
}
 0x217   :  { %363 = dma.vmem_to_hbm [thread:$0]  %s361_s6, 128, %s599_s4, [#allocation6]   ;;  %v426_v63 = vpop.f32.mrf.mxu0 }
 0x218   :  { %532 = dma.done.wait [#allocation6], 128  }
 0x219   :  { %533 = vsyncadd [#allocation6], 4294967168 }
 0x21a   :  { %367 = vsyncpa [#allocation5], 1 }
 0x21b   :  { %368 = vsyncpa [#allocation8], 1 }
 0x21c   :  { %369 = vsyncpa [#allocation6], 1 }

</bundles_post_ra>
